<compile_context>
chip_gen: v7x
topology: tpu7x:2x2x1
jax: 0.10.0
libtpu: 0.0.40
codegen_flags: <defaults>
</compile_context>

<pallas_src>
import jax
import jax.numpy as jnp
from jax.experimental import pallas as pl
from jax.experimental.pallas import tpu as pltpu


def _row_max_kernel(x_ref, o_ref):
    # x_ref: (1, tile_r, tile_s, L) input block
    # o_ref: (1, tile_s, L) output block, resident across the reduction axis
    r = pl.program_id(2)

    # Reduce this tile over the reduction axis (axis 1 of the block).  tile_r is
    # above the sublane/lane dims, so this is tile_r-1 full-vreg VPU max ops.
    tile_max = jnp.max(x_ref[...], axis=1)  # (1, tile_s, L)

    @pl.when(r == 0)
    def _first():
        # Initialize directly from the first tile (no -inf fill, no first RMW).
        o_ref[...] = tile_max

    @pl.when(r > 0)
    def _fold():
        o_ref[...] = jnp.maximum(o_ref[...], tile_max)


def _choose_trailing_layout(n_keep, feat):
    """Pick a lane-dense (S, L) reshape of the trailing (n_keep, feat) plane."""
    plane = n_keep * feat
    # Prefer layouts where L is a multiple of 128 AND S is a multiple of 8
    # (fully packed vregs, unmasked lane-dense stores).
    for cand_l in (2048, 1024, 512, 256, 128):
        if plane % cand_l == 0 and (plane // cand_l) % 8 == 0:
            return plane // cand_l, cand_l
    # Next best: lane-dense only.
    for cand_l in (2048, 1024, 512, 256, 128):
        if plane % cand_l == 0:
            return plane // cand_l, cand_l
    # Fallback: keep the original trailing layout (full-extent dims are legal).
    return n_keep, feat


def row_max_pooling(x, *, target_in_block_bytes=4 << 20, max_out_block_bytes=1 << 20):
    """Pallas implementation of RowMaxPooling.forward.

    x: (bs, n_vertices, n_vertices, in_features)
    returns: (bs, n_vertices, in_features), max over axis 1.
    """
    bs, n_red, n_keep, feat = x.shape
    itemsize = jnp.dtype(x.dtype).itemsize

    # 1) Lane-dense trailing layout (semantics-preserving: max over axis 1 is
    #    elementwise over the trailing plane).
    s_dim, l_dim = _choose_trailing_layout(n_keep, feat)
    x3 = x.reshape(bs, n_red, s_dim, l_dim)

    # 2) Tile the (sublane) S axis — gives a second parallel grid axis and keeps
    #    the resident output block small.
    if s_dim % 8 == 0:
        cands = [d for d in range(8, s_dim + 1, 8) if s_dim % d == 0]
        fits = [d for d in cands if d * l_dim * itemsize <= max_out_block_bytes]
        tile_s = max(fits) if fits else min(cands)
    else:
        tile_s = s_dim

    # 3) Size the reduction tile by VMEM budget (several-MiB input blocks amortize
    #    the ~0.35 us per-grid-step overhead and keep DMAs near HBM roofline).
    row_bytes = tile_s * l_dim * itemsize
    max_rows = max(1, target_in_block_bytes // row_bytes)
    tile_r = max(d for d in range(1, n_red + 1) if n_red % d == 0 and d <= max_rows)

    in_block_bytes = tile_r * tile_s * l_dim * itemsize
    out_block_bytes = tile_s * l_dim * itemsize
    # Double-buffered input + output windows + headroom; at least 32 MiB scoped,
    # which is safe on v5e/v6e (128 MiB physical) and v7x (64 MiB physical).
    vmem_limit = int(max(2 * (in_block_bytes + out_block_bytes) + (2 << 20), 32 << 20))

    grid = (bs, s_dim // tile_s, n_red // tile_r)

    y3 = pl.pallas_call(
        _row_max_kernel,
        out_shape=jax.ShapeDtypeStruct((bs, s_dim, l_dim), x.dtype),
        grid_spec=pltpu.PrefetchScalarGridSpec(
            num_scalar_prefetch=0,
            grid=grid,
            in_specs=[
                pl.BlockSpec((1, tile_r, tile_s, l_dim), lambda b, s, r: (b, r, s, 0)),
            ],
            out_specs=pl.BlockSpec((1, tile_s, l_dim), lambda b, s, r: (b, s, 0)),
        ),
        compiler_params=pltpu.CompilerParams(
            dimension_semantics=("parallel", "parallel", "arbitrary"),
            vmem_limit_bytes=vmem_limit,
        ),
    )(x3)

    return y3.reshape(bs, n_keep, feat)


if __name__ == "__main__":
    key = jax.random.PRNGKey(0)

    # Primary config: exercises the fully packed (tile_s=8, L=128) lane-dense path.
    bs, n_vertices, in_features = 2, 16, 64
    x = jax.random.normal(
        key, (bs, n_vertices, n_vertices, in_features), dtype=jnp.float32
    )
    y = jax.block_until_ready(row_max_pooling(x))
    y_ref = jnp.max(x, axis=1)  # same semantics as torch.max(x, 1)[0]
    assert y.shape == (bs, n_vertices, in_features)
    assert jnp.allclose(y, y_ref), "mismatch vs reference (config 1)"

    # Secondary config (feat=32): trailing plane reshaped to (1, 512) lane-dense.
    x2 = jax.random.normal(
        jax.random.PRNGKey(0), (2, 16, 16, 32), dtype=jnp.float32
    )
    y2 = jax.block_until_ready(row_max_pooling(x2))
    assert jnp.allclose(y2, jnp.max(x2, axis=1)), "mismatch vs reference (config 2)"

    print("KERNEL_OK")
</pallas_src>

<mosaic_0001>
module attributes {stable_mosaic.version = 11 : i64} {
  func.func @_row_max_kernel(%arg0: i32, %arg1: i32, %arg2: i32, %arg3: memref<1x16x8x128xf32, #tpu.memory_space<vmem>>, %arg4: memref<1x8x128xf32, #tpu.memory_space<vmem>>) attributes {dimension_semantics = [#tpu.dimension_semantics<parallel>, #tpu.dimension_semantics<parallel>, #tpu.dimension_semantics<arbitrary>], iteration_bounds = array<i64: 2, 1, 1>, scalar_prefetch = 0 : i64, scratch_operands = 0 : i64, tpu.core_type = #tpu.core_type<tc>, window_params = [{transform_indices = @transform_0, window_bounds = array<i64: 1, 16, 8, 128>}, {transform_indices = @transform_1, window_bounds = array<i64: 1, 8, 128>}]} {
    %c0 = arith.constant 0 : index
    %c0_0 = arith.constant 0 : index
    %c0_1 = arith.constant 0 : index
    %c0_2 = arith.constant 0 : index
    %0 = vector.load %arg3[%c0, %c0_0, %c0_1, %c0_2] : memref<1x16x8x128xf32, #tpu.memory_space<vmem>>, vector<1x16x8x128xf32>
    %cst = arith.constant dense<0xFF800000> : vector<1x8x128xf32>
    %1 = vector.multi_reduction <maximumf>, %0, %cst [1] : vector<1x16x8x128xf32> to vector<1x8x128xf32>
    %c0_i32 = arith.constant 0 : i32
    %2 = arith.cmpi eq, %arg2, %c0_i32 : i32
    %3 = arith.extui %2 : i1 to i32
    %c0_i32_3 = arith.constant 0 : i32
    %4 = arith.cmpi ne, %3, %c0_i32_3 : i32
    scf.if %4 {
      %c0_6 = arith.constant 0 : index
      %c0_7 = arith.constant 0 : index
      %c0_8 = arith.constant 0 : index
      %8 = vector.load %arg4[%c0_6, %c0_7, %c0_8] : memref<1x8x128xf32, #tpu.memory_space<vmem>>, vector<1x8x128xf32>
      tpu.vector_store %arg4[%c0_6, %c0_7, %c0_8], %1 {strides = array<i32>} : memref<1x8x128xf32, #tpu.memory_space<vmem>>, vector<1x8x128xf32>,
    } else {
    }
    %c0_i32_4 = arith.constant 0 : i32
    %5 = arith.cmpi sgt, %arg2, %c0_i32_4 : i32
    %6 = arith.extui %5 : i1 to i32
    %c0_i32_5 = arith.constant 0 : i32
    %7 = arith.cmpi ne, %6, %c0_i32_5 : i32
    scf.if %7 {
      %c0_6 = arith.constant 0 : index
      %c0_7 = arith.constant 0 : index
      %c0_8 = arith.constant 0 : index
      %8 = vector.load %arg4[%c0_6, %c0_7, %c0_8] : memref<1x8x128xf32, #tpu.memory_space<vmem>>, vector<1x8x128xf32>
      %9 = arith.maximumf %8, %1 : vector<1x8x128xf32>
      %c0_9 = arith.constant 0 : index
      %c0_10 = arith.constant 0 : index
      %c0_11 = arith.constant 0 : index
      %10 = vector.load %arg4[%c0_9, %c0_10, %c0_11] : memref<1x8x128xf32, #tpu.memory_space<vmem>>, vector<1x8x128xf32>
      tpu.vector_store %arg4[%c0_9, %c0_10, %c0_11], %9 {strides = array<i32>} : memref<1x8x128xf32, #tpu.memory_space<vmem>>, vector<1x8x128xf32>,
    } else {
    }
    return
  }
  func.func @transform_0(%arg0: i32, %arg1: i32, %arg2: i32) -> (i32, i32, i32, i32) {
    %c0_i32 = arith.constant 0 : i32
    %c0_i32_0 = arith.constant 0 : i32
    return %arg0, %arg2, %arg1, %c0_i32 : i32, i32, i32, i32
  }
  func.func @transform_1(%arg0: i32, %arg1: i32, %arg2: i32) -> (i32, i32, i32) {
    %c0_i32 = arith.constant 0 : i32
    %c0_i32_0 = arith.constant 0 : i32
    return %arg0, %arg1, %c0_i32 : i32, i32, i32
  }
}

</mosaic_0001>

<bundles_post_ra>
// kernel: tpu_custom_call.1
= control target key start
LH: loop header
LB: loop body
LE: loop exit
PB: predicated region body
PF: predicated region fallthrough
CT: control target
= control target key end

     0   :  { %6 = vsyncpa [#allocation3], 0  ;;  %s689_s0 = inlined_call_operand.hbm [shape: f32[2,16,8,128], index: 0, kind: input, shape index: {}]   ;;  %s690_s1 = inlined_call_operand.hbm [shape: f32[2,8,128], index: 1, kind: output, shape index: {}]  }
   0x1   :  { %8 = vsyncpa [#allocation3 + $0x1], 0 }
   0x2   :  { %9 = vsyncpa [#allocation4], 0 }
   0x3   :  { %11 = vsyncpa [#allocation4 + $0x1], 0  ;;  %s515_s6 = smov 0   ;;  %s517_s7 = smov 0  }
   0x4   :  { %s519_s8 = smov 0   ;;  %s521_s9 = smov 0  }
   0x5   :  { %s523_s10 = smov 0   ;;  %s525_s11 = smov 0  }
   0x6 LB: > { %s308_s12 = sadd.s32 4294967295, %s499_s11   ;;  %s309_s13 = sadd.s32 4294967294, %s499_s11   ;;  %s499_s11 = sphi %s525_s11, %s17_s11   ;;  %s495_s10 = sphi %s523_s10, %s705_s10   ;;  %s491_s9 = sphi %s521_s9, %s704_s9   ;;  %s487_s8 = sphi %s519_s8, %s703_s8   ;;  %s483_s7 = sphi %s517_s7, %s702_s7   ;;  %s479_s6 = sphi %s515_s6, %s701_s6  }
   0x7   : > { %s36_s14 = sadd.s32 1, %s495_s10  ;;  %s47_s15 = sadd.s32 1, %s487_s8 }
   0x8   : > { %p38_p0 = scmp.ge.s32.totalorder %s36_s14, 2  ;;  %p54_p1 = scmp.ne.s32.totalorder %s487_s8, %s483_s7 }
   0x9   : > { %p55_p2 = scmp.eq.s32.totalorder %s499_s11, 0  ;;  %p60_p3 = scmp.ne.s32.totalorder %s483_s7, %s479_s6 }
   0xa   : > { %s707_s14 = smov (%p38_p0, %s36_s14), 0  ;;  %p61_p5 = scmp.eq.s32.totalorder %s308_s12, 0 }
   0xb   : > { %p556_p4 = por %p55_p2, %p54_p1  ;;  %s40_s17 = ssub.s32 %s495_s10, %s707_s14 }
   0xc   : > { %p86_p6 = scmp.eq.s32.totalorder %s308_s12, 1  ;;  %p45_p7 = scmp.eq.s32.totalorder %s40_s17, 0 }
   0xd   : > { %p562_p8 = por %p61_p5, %p60_p3  ;;  %p92_p10 = scmp.eq.s32.totalorder %s309_s13, 1 }
   0xe   : > { %p566_p9 = por %p86_p6, %p54_p1  ;;  %p335_p13 = scmp.lt.s32.totalorder %s499_s11, 2 }
   0xf   : > { %s571_s20 = scalar_select %p45_p7, %s487_s8, %s47_s15  }
  0x10   : > { %s694_s19 = scalar_select %p566_p9, 1, 0 }
  0x11   : > { %p573_p11 = por %p92_p10, %p60_p3  ;;  %s112_s22 = sand.u32 1, %s487_s8  }
  0x12   : > { %s312_s23 = sshll.u32 %s112_s22, 7  ;;  %s322_s24 = sshll.u32 %s495_s10, 11 }
  0x13   : > { %s695_s21 = scalar_select %p573_p11, 1, 0 }
  0x14   : > { %s584_s27 = scalar_lea.hbm %s689_s0, %s322_s24  ;;  %s116_s28 = scalar_lea.vmem [#allocation2], %s312_s23 }
  0x15   : > { %s126_s29 = sshll.u32 %s116_s28, 4  ;;  %p590_p0 = pnand %p335_p13, %p556_p4  ;;  %s586_s29 = int_to_ptr.vmem [resolvable:$true] %s126_s29 }
  0x16   : > { %s595_s2 = scalar_lea.sflag [#allocation3], %s112_s22  ;;  %s387_s3 = scalar_lea.hbm %s584_s27, 2048 }
  0x17   : > { %p388_p2 = scmp.ne.s32.totalorder %s584_s27, %s387_s3  ;;  %p389_p3 = pneg %p590_p0 }
  0x18   : > { %s392_s12 = scalar_lea.hbm %s689_s0, 4096  ;;  %p393_p4 = scmp.lt.u32.totalorder %s584_s27, %s689_s0 }
  0x19   : > { %p390_p5 = pnand %p389_p3, %p388_p2  ;;  %p394_p7 = scmp.lt.u32.totalorder %s392_s12, %s387_s3 }
  0x1a   : > { %p396_p13 = scmp.lt.u32.totalorder %s387_s3, %s584_s27 }
  0x1b   : > { %p391_p6 = pneg %p390_p5  ;;  %p395_p10 = por %p394_p7, %p393_p4 }
  0x1d   : > { %p397_p12 = por %p396_p13, %p395_p10 }
  0x1f   : > { %p398_p1 = pnand %p397_p12, %p391_p6 }
  0x21   : > { %401 = shalt.err (!%p398_p1)
}
  0x22   : > { %s402_s16 = scalar_lea.vmem %s586_s29, 2048  ;;  %s501_s17 = smov [#allocation2]  }
  0x23   : > { %p403_p2 = scmp.ne.s32.totalorder %s586_s29, %s402_s16  ;;  %s407_s22 = sshll.u32 %s501_s17, 4  ;;  %s408_s22 = int_to_ptr.vmem [resolvable:$false] %s407_s22 }
  0x24   : > { %s409_s23 = scalar_lea.vmem %s408_s22, 4096  ;;  %p410_p9 = scmp.lt.s32.totalorder %s586_s29, %s408_s22 }
  0x25   : > { %p405_p5 = pnand %p403_p2, %p389_p3  ;;  %p411_p4 = scmp.lt.s32.totalorder %s409_s23, %s402_s16 }
  0x27   : > { %p406_p11 = pneg %p405_p5  ;;  %p412_p7 = por %p411_p4, %p410_p9 }
  0x29   : > { %p413_p10 = pnand %p412_p7, %p406_p11 }
  0x2b   : > { %416 = shalt.err (!%p413_p10)
}
  0x2c   : > { %s502_s24 = smov 128   ;;  %s503_s25 = smov 8  }
  0x2d   : > { %330 = dma.hbm_to_vmem [thread:$0]  (!%p590_p0), %s584_s27, 2048, %s586_s29, %s595_s2, %s502_s24, %s502_s24, %s503_s25  }
  0x2e   : > { %p134_p12 = scmp.lt.s32.totalorder %s499_s11, 3  ;;  %p697_p1 = scmp.ge.s32.totalorder %s499_s11, 1 }
  0x30   : > { %p135_p3 = pnand %p697_p1, %p134_p12 }
  0x31   : > { %s627_s26 = sand.u32 (!%p135_p3), 1, %s483_s7  }
  0x32   : > { %138 = sbr.rel (%p135_p3) target bundleno = 85 (0x55), region = 24  ;;  %s316_s28 = sshll.u32 (!%p135_p3), %s627_s26, 7 }
  0x33   : > { %s141_s3 = scalar_lea.sflag (!%p135_p3), [#allocation3], %s627_s26  ;;  %s144_s4 = scalar_lea.vmem (!%p135_p3), [#allocation2], %s316_s28 }
  0x39   : > { %470 = dma.done.wait (%p562_p8), %s141_s3, 2048  }
  0x3a   : > { %472 = vsyncadd (%p562_p8), %s141_s3, 4294965248  ;;  %v164_v0 = vld [vmem:[%s144_s4] sm:$0xff]  ;;  %v165_v1 = vld [vmem:[%s144_s4 + $0x8] sm:$0xff]  ;;  %s317_s27 = sshll.u32 %s627_s26, 3  ;;  %s319_s30 = sshll.u32 %s491_s9, 7 }
  0x3b   : > { %v166_v2 = vld [vmem:[%s144_s4 + $0x10] sm:$0xff]  ;;  %v167_v3 = vld [vmem:[%s144_s4 + $0x18] sm:$0xff]  ;;  %v168_v4 = vld [vmem:[%s144_s4 + $0x20] sm:$0xff]  ;;  %s162_s18 = scalar_lea.vmem [#allocation5], %s317_s27  ;;  %s642_s12 = scalar_lea.hbm %s690_s1, %s319_s30 }
  0x3c   : > { %v169_v5 = vld [vmem:[%s144_s4 + $0x28] sm:$0xff]  ;;  %v170_v6 = vld [vmem:[%s144_s4 + $0x30] sm:$0xff]  ;;  %v171_v7 = vld [vmem:[%s144_s4 + $0x38] sm:$0xff]  ;;  %v180_v9 = vmax.f32 %v164_v0, %v168_v4  ;;  %s222_s29 = sshll.u32 %s162_s18, 4  ;;  %s208_s13 = scalar_lea.sflag [#allocation4], %s627_s26  ;;  %s637_s29 = int_to_ptr.vmem [resolvable:$true] %s222_s29 }
  0x3d   : > { %v172_v8 = vld [vmem:[%s144_s4 + $0x40] sm:$0xff]  ;;  %v181_v10 = vmax.f32 %v165_v1, %v169_v5  ;;  %v173_v11 = vld [vmem:[%s144_s4 + $0x48] sm:$0xff]  ;;  %v174_v12 = vld [vmem:[%s144_s4 + $0x50] sm:$0xff]  ;;  %v182_v14 = vmax.f32 %v166_v2, %v170_v6  ;;  %v183_v15 = vmax.f32 %v167_v3, %v171_v7  ;;  %s417_s15 = scalar_lea.vmem %s637_s29, 128  ;;  %p698_p9 = scmp.ne.s32.totalorder %s694_s19, 0 }
  0x3e   : > { %v175_v13 = vld [vmem:[%s144_s4 + $0x58] sm:$0xff]  ;;  %v176_v16 = vld [vmem:[%s144_s4 + $0x60] sm:$0xff]  ;;  %v177_v17 = vld [vmem:[%s144_s4 + $0x68] sm:$0xff]  ;;  %v184_v19 = vmax.f32 %v180_v9, %v172_v8  ;;  %p418_p8 = scmp.ne.s32.totalorder %s637_s29, %s417_s15  ;;  %s504_s9 = smov [#allocation5]  }
  0x3f   : > { %v178_v18 = vld [vmem:[%s144_s4 + $0x70] sm:$0xff]  ;;  %v185_v20 = vmax.f32 %v181_v10, %v173_v11  ;;  %v179_v21 = vld [vmem:[%s144_s4 + $0x78] sm:$0xff]  ;;  %v186_v22 = vmax.f32 %v182_v14, %v174_v12  ;;  %v187_v23 = vmax.f32 %v183_v15, %v175_v13  ;;  %s421_s16 = sshll.u32 %s504_s9, 4  ;;  %s422_s16 = int_to_ptr.vmem [resolvable:$false] %s421_s16 }
  0x40   : > { %v188_v24 = vmax.f32 %v184_v19, %v176_v16  ;;  %p419_p11 = pnand %p418_p8, %p698_p9  ;;  %s423_s17 = scalar_lea.vmem %s422_s16, 256 }
  0x41   : > { %v189_v25 = vmax.f32 %v185_v20, %v177_v17  ;;  %v190_v26 = vmax.f32 %v186_v22, %v178_v18  ;;  %v191_v27 = vmax.f32 %v187_v23, %v179_v21  ;;  %p424_p6 = scmp.lt.s32.totalorder %s637_s29, %s422_s16  ;;  %p425_p13 = scmp.lt.s32.totalorder %s423_s17, %s417_s15 }
  0x42   : > { %p420_p0 = pneg %p419_p11 }
  0x43   : > { %v192_v28 = vmax.f32 %v188_v24, %v189_v25  ;;  %v193_v29 = vmax.f32 %v190_v26, %v191_v27  ;;  %p426_p2 = por %p425_p13, %p424_p6 }
  0x45   : > { %v194_v30 = vmax.f32 %v192_v28, %v193_v29  ;;  %p427_p5 = pnand %p426_p2, %p420_p0 }
  0x47   : > { %199 = vst [vmem:[%s162_s18] sm:$0xff] %v194_v30 }
  0x48   : > { %430 = shalt.err (!%p427_p5)
}
  0x49   : > { %s431_s22 = scalar_lea.hbm %s642_s12, 128  ;;  %s435_s25 = scalar_lea.hbm %s690_s1, 256 }
  0x4a   : > { %p432_p4 = scmp.ne.s32.totalorder %s642_s12, %s431_s22  ;;  %p436_p12 = scmp.lt.u32.totalorder %s642_s12, %s690_s1 }
  0x4b   : > { %p437_p1 = scmp.lt.u32.totalorder %s435_s25, %s431_s22  ;;  %p439_p8 = scmp.lt.u32.totalorder %s431_s22, %s642_s12 }
  0x4c   : > { %p433_p7 = pnand %p432_p4, %p698_p9 }
  0x4d   : > { %p438_p3 = por %p437_p1, %p436_p12 }
  0x4e   : > { %p434_p10 = pneg %p433_p7 }
  0x4f   : > { %p440_p11 = por %p439_p8, %p438_p3 }
  0x51   : > { %p441_p0 = pnand %p440_p11, %p434_p10 }
  0x53   : > { %444 = shalt.err (!%p441_p0)
}
  0x54   : > { %325 = dma.vmem_to_hbm [thread:$0]  (%p698_p9), %s637_s29, 128, %s642_s12, %s208_s13  }
  0x55 PF: > { %s234_s3 = sand.u32 1, %s479_s6   ;;  %p699_p6 = scmp.ne.s32.totalorder %s695_s21, 0 }
  0x56   : > { %p700_p13 = scmp.ge.s32.totalorder %s499_s11, 2  ;;  %s235_s4 = scalar_lea.sflag [#allocation4], %s234_s3 }
  0x58   : > { %p332_p2 = pnand %p700_p13, %p699_p6 }
  0x5a   : > { %474 = dma.done.wait (!%p332_p2), %s235_s4, 128  }
  0x5b   : > { %476 = vsyncadd (!%p332_p2), %s235_s4, 4294967168  ;;  %s17_s11 = sadd.s32 1, %s499_s11   ;;  %s701_s6 = smov %s483_s7 }
  0x5c   : > { %p14_p5 = scmp.ge.s32.totalorder %s17_s11, 4   ;;  %s702_s7 = smov %s487_s8 }
  0x5d   : > { %s703_s8 = smov %s571_s20  ;;  %s704_s9 = smov %s495_s10 }
  0x5e   : > { %s705_s10 = smov %s707_s14  ;;  %16 = sbr.rel (!%p14_p5) target bundleno = 6 (0x6), region = 77 }
  0x65   :  { %240 = vsyncpa [#allocation3], 1 }
  0x66   :  { %242 = vsyncpa [#allocation3 + $0x1], 1 }
  0x67   :  { %243 = vsyncpa [#allocation4], 1 }
  0x68   :  { %245 = vsyncpa [#allocation4 + $0x1], 1 }

</bundles_post_ra>
